<compile_context>
chip_gen: v7x
topology: tpu7x:2x2x1
jax: 0.10.0
libtpu: 0.0.40
codegen_flags: <defaults>
</compile_context>

<pallas_src>
import functools

import jax
import jax.numpy as jnp
from jax import lax
from jax.experimental import pallas as pl
from jax.experimental.pallas import tpu as pltpu

_SLAB = 8                              # rows per inner slab (one sublane group)
_VMEM_LIMIT_BYTES = 48 * 1024 * 1024   # safe on v5e/v6e (128 MiB) and v7x (64 MiB)


def _cdiv(a, b):
    return -(-a // b)


def _detect_num_tensorcores():
    """Best-effort count of TensorCores one Pallas program can shard over
    via dimension_semantics=('parallel', ...).  Falls back to 1 (always
    correct, just no megacore sharding)."""
    try:
        kind = jax.devices()[0].device_kind.lower()
    except Exception:
        return 1
    if any(tag in kind for tag in ("v4", "v5p", "v7", "7x")):
        return 2
    return 1


def _dice_sums_kernel(pred_ref, gt_ref, mask_ref, inter_ref, union_ref, *,
                      nblocks, block_rows, rows_total, slab, n_slabs, unroll,
                      has_phantom):
    c = pl.program_id(0)           # core ("parallel") axis
    b = pl.program_id(1)           # reduction ("arbitrary") axis
    bpc = pl.num_programs(1)
    gblk = c * bpc + b             # global row-block index
    width = pred_ref.shape[1]

    # Initialize this core's resident accumulators on its first reduction step.
    @pl.when(b == 0)
    def _init():
        inter_ref[...] = jnp.zeros_like(inter_ref)
        union_ref[...] = jnp.zeros_like(union_ref)

    def accumulate(masked):
        if masked:
            # Only the single ragged tail block ever takes this path.
            valid_rows = rows_total - gblk * block_rows
            row_iota = lax.broadcasted_iota(jnp.int32, (slab, width), 0)

        def slab_body(s, carry):
            u_acc, i_acc = carry
            r0 = pl.multiple_of(s * slab, slab)
            # Stream native dtype from the VMEM block; upcast in-register.
            p = pred_ref[pl.ds(r0, slab), :].astype(jnp.float32)
            g = gt_ref[pl.ds(r0, slab), :].astype(jnp.float32)
            m = mask_ref[pl.ds(r0, slab), :].astype(jnp.float32)
            u = (p + g) * m        # sums to  sum(p*m) + sum(g*m)
            it = (p * g) * m       # sums to  intersection
            if masked:
                # Select (not multiply) so garbage rows (possibly NaN/Inf read
                # past the array end) cannot leak into the sums.
                ok = (row_iota + r0) < valid_rows
                u = jnp.where(ok, u, 0.0)
                it = jnp.where(ok, it, 0.0)
            return (u_acc + u, i_acc + it)

        zeros = jnp.zeros((slab, width), jnp.float32)
        u_acc, i_acc = lax.fori_loop(0, n_slabs, slab_body, (zeros, zeros),
                                     unroll=unroll)
        union_ref[0] = union_ref[0] + u_acc
        inter_ref[0] = inter_ref[0] + i_acc

    ragged = (rows_total % block_rows) != 0     # static python bool
    if ragged:
        # Full blocks take the lean path; only the ragged tail block pays for
        # the row mask.  Phantom blocks (gblk >= nblocks, only possible when
        # nblocks doesn't split evenly across cores) match neither predicate
        # and are skipped.
        pl.when(gblk == nblocks - 1)(lambda: accumulate(True))
        pl.when(gblk < nblocks - 1)(lambda: accumulate(False))
    elif has_phantom:
        pl.when(gblk < nblocks)(lambda: accumulate(False))
    else:
        accumulate(False)


def _dice_sums(pred, gt, mask):
    """pred/gt/mask: identical (rows, width) 2-D views, any real dtype.
    Returns (sum(p*g*m), sum(p*m)+sum(g*m)) as f32 scalars."""
    rows_total, width = pred.shape
    ncores_hw = _detect_num_tensorcores()

    itemsize = max(jnp.dtype(x.dtype).itemsize for x in (pred, gt, mask))
    # ~2 MiB / input / buffer on 2-TC chips (v7x VMEM is 64 MiB per TC),
    # ~4 MiB on single-TC 128-MiB-VMEM chips (v5e/v6e).
    target_bytes = (2 if ncores_hw > 1 else 4) * 1024 * 1024
    target_rows = max(_SLAB,
                      (target_bytes // max(1, width * itemsize)) // _SLAB * _SLAB)

    if rows_total <= _SLAB:
        block_rows = rows_total          # full extent (allowed even if < 8)
        slab = rows_total
    else:
        block_rows = max(_SLAB, (min(target_rows, rows_total) // _SLAB) * _SLAB)
        slab = _SLAB
    n_slabs = block_rows // slab

    nblocks = _cdiv(rows_total, block_rows)
    ncores = max(1, min(ncores_hw, nblocks))
    bpc = _cdiv(nblocks, ncores)
    has_phantom = (ncores * bpc != nblocks)

    if has_phantom:
        # Clamp phantom blocks onto the last real block (cheap re-read; the
        # kernel skips their accumulation) so the DMA never walks off the end.
        def in_idx(c, b):
            return (jnp.minimum(c * bpc + b, nblocks - 1), 0)
    else:
        def in_idx(c, b):
            return (c * bpc + b, 0)

    in_spec = pl.BlockSpec((block_rows, width), in_idx)
    out_spec = pl.BlockSpec((1, slab, width), lambda c, b: (c, 0, 0))
    out_sh = jax.ShapeDtypeStruct((ncores, slab, width), jnp.float32)

    kernel = functools.partial(
        _dice_sums_kernel,
        nblocks=nblocks, block_rows=block_rows, rows_total=rows_total,
        slab=slab, n_slabs=n_slabs, unroll=min(8, n_slabs),
        has_phantom=has_phantom)

    inter, union = pl.pallas_call(
        kernel,
        out_shape=(out_sh, out_sh),
        grid_spec=pltpu.PrefetchScalarGridSpec(
            num_scalar_prefetch=0,
            grid=(ncores, bpc),
            in_specs=[in_spec, in_spec, in_spec],
            out_specs=[out_spec, out_spec],
        ),
        compiler_params=pltpu.CompilerParams(
            dimension_semantics=("parallel", "arbitrary"),
            vmem_limit_bytes=_VMEM_LIMIT_BYTES,
        ),
    )(pred, gt, mask)

    # O(1) final cross-lane / cross-core combine outside the kernel.
    return jnp.sum(inter), jnp.sum(union)


def _take_channel0(x):
    if x.ndim == 4:
        if x.shape[1] == 1:
            # Squeezing a size-1 dim is a free contiguous reshape (no HBM copy).
            return x.reshape(x.shape[0], x.shape[2], x.shape[3])
        return x[:, 0]
    return x


def dice_loss(pred, gt, mask, eps=1e-6):
    """Core dice loss. pred/gt may be (N,1,H,W) NCHW or (N,H,W); mask (N,H,W)."""
    pred = _take_channel0(pred)
    gt = _take_channel0(gt)
    assert pred.shape == gt.shape == mask.shape
    width = pred.shape[-1]
    # Free contiguous reshapes -- no host-side padding or copies.
    p2 = pred.reshape(-1, width)
    g2 = gt.reshape(-1, width)
    m2 = mask.reshape(-1, width)
    inter, union = _dice_sums(p2, g2, m2)
    return 1.0 - 2.0 * inter / (union + eps)


def db_dice_loss_forward(pred, batch, eps=1e-6):
    """Equivalent of DiceLoss.forward(pred, batch) from db_loss.py."""
    loss = dice_loss(pred["binary"], batch["gt"], batch["mask"], eps=eps)
    return loss, dict(dice_loss=loss)


if __name__ == "__main__":
    key = jax.random.PRNGKey(0)
    k1, k2, k3 = jax.random.split(key, 3)

    N, H, W = 2, 16, 16
    # pred['binary'] is a probability map in [0, 1], NCHW with C=1.
    pred_binary = jax.nn.sigmoid(jax.random.normal(k1, (N, 1, H, W), jnp.float32))
    # gt is a binary map, same shape; mask is (N, H, W) in {0, 1}.
    gt = (jax.random.uniform(k2, (N, 1, H, W)) > 0.5).astype(jnp.float32)
    mask = (jax.random.uniform(k3, (N, H, W)) > 0.2).astype(jnp.float32)

    pred = {"binary": pred_binary}
    batch = {"gt": gt, "mask": mask}

    loss, metrics = db_dice_loss_forward(pred, batch)
    loss = jax.block_until_ready(loss)

    # Pure-JAX reference check (silent on success).
    p = pred_binary[:, 0]
    g = gt[:, 0]
    inter_ref = jnp.sum(p * g * mask)
    union_ref = jnp.sum(p * mask) + jnp.sum(g * mask) + 1e-6
    loss_ref = 1.0 - 2.0 * inter_ref / union_ref
    assert jnp.allclose(loss, loss_ref, atol=1e-5, rtol=1e-5), (loss, loss_ref)
    assert jnp.allclose(metrics["dice_loss"], loss)

    print("KERNEL_OK")
</pallas_src>

<mosaic_0001>
module attributes {stable_mosaic.version = 11 : i64} {
  func.func @_dice_sums_kernel(%arg0: i32, %arg1: i32, %arg2: memref<32x16xf32, #tpu.memory_space<vmem>>, %arg3: memref<32x16xf32, #tpu.memory_space<vmem>>, %arg4: memref<32x16xf32, #tpu.memory_space<vmem>>, %arg5: memref<1x8x16xf32, #tpu.memory_space<vmem>>, %arg6: memref<1x8x16xf32, #tpu.memory_space<vmem>>) attributes {dimension_semantics = [#tpu.dimension_semantics<parallel>, #tpu.dimension_semantics<arbitrary>], iteration_bounds = array<i64: 1, 1>, scalar_prefetch = 0 : i64, scratch_operands = 0 : i64, tpu.core_type = #tpu.core_type<tc>, window_params = [{transform_indices = @transform_0, window_bounds = array<i64: 32, 16>}, {transform_indices = @transform_1, window_bounds = array<i64: 32, 16>}, {transform_indices = @transform_2, window_bounds = array<i64: 32, 16>}, {transform_indices = @transform_3, window_bounds = array<i64: 1, 8, 16>}, {transform_indices = @transform_4, window_bounds = array<i64: 1, 8, 16>}]} {
    %c0_i32 = arith.constant 0 : i32
    %0 = arith.cmpi eq, %arg1, %c0_i32 : i32
    %1 = arith.extui %0 : i1 to i32
    %c0_i32_0 = arith.constant 0 : i32
    %2 = arith.cmpi ne, %1, %c0_i32_0 : i32
    scf.if %2 {
      %cst_28 = arith.constant 0.000000e+00 : f32
      %72 = vector.broadcast %cst_28 : f32 to vector<1x8x16xf32>
      %c0_29 = arith.constant 0 : index
      %c0_30 = arith.constant 0 : index
      %c0_31 = arith.constant 0 : index
      %73 = vector.load %arg5[%c0_29, %c0_30, %c0_31] : memref<1x8x16xf32, #tpu.memory_space<vmem>>, vector<1x8x16xf32>
      tpu.vector_store %arg5[%c0_29, %c0_30, %c0_31], %72 {strides = array<i32>} : memref<1x8x16xf32, #tpu.memory_space<vmem>>, vector<1x8x16xf32>,
      %cst_32 = arith.constant 0.000000e+00 : f32
      %74 = vector.broadcast %cst_32 : f32 to vector<1x8x16xf32>
      %c0_33 = arith.constant 0 : index
      %c0_34 = arith.constant 0 : index
      %c0_35 = arith.constant 0 : index
      %75 = vector.load %arg6[%c0_33, %c0_34, %c0_35] : memref<1x8x16xf32, #tpu.memory_space<vmem>>, vector<1x8x16xf32>
      tpu.vector_store %arg6[%c0_33, %c0_34, %c0_35], %74 {strides = array<i32>} : memref<1x8x16xf32, #tpu.memory_space<vmem>>, vector<1x8x16xf32>,
    } else {
    }
    %cst = arith.constant 0.000000e+00 : f32
    %3 = vector.broadcast %cst : f32 to vector<8x16xf32>
    %c0_i32_1 = arith.constant 0 : i32
    %c8_i32 = arith.constant 8 : i32
    %4 = arith.muli %c0_i32_1, %c8_i32 : i32
    %5 = tpu.assume_multiple %4, 8 : i32
    %6 = arith.index_cast %5 : i32 to index
    %c0 = arith.constant 0 : index
    %7 = vector.load %arg2[%6, %c0] : memref<32x16xf32, #tpu.memory_space<vmem>>, vector<8x16xf32>
    %8 = arith.index_cast %5 : i32 to index
    %c0_2 = arith.constant 0 : index
    %9 = vector.load %arg3[%8, %c0_2] : memref<32x16xf32, #tpu.memory_space<vmem>>, vector<8x16xf32>
    %10 = arith.index_cast %5 : i32 to index
    %c0_3 = arith.constant 0 : index
    %11 = vector.load %arg4[%10, %c0_3] : memref<32x16xf32, #tpu.memory_space<vmem>>, vector<8x16xf32>
    %12 = arith.addf %7, %9 : vector<8x16xf32>
    %13 = arith.mulf %12, %11 : vector<8x16xf32>
    %14 = arith.mulf %7, %9 : vector<8x16xf32>
    %15 = arith.mulf %14, %11 : vector<8x16xf32>
    %16 = arith.addf %3, %13 : vector<8x16xf32>
    %17 = arith.addf %3, %15 : vector<8x16xf32>
    %c1_i32 = arith.constant 1 : i32
    %c8_i32_4 = arith.constant 8 : i32
    %18 = arith.muli %c1_i32, %c8_i32_4 : i32
    %19 = tpu.assume_multiple %18, 8 : i32
    %20 = arith.index_cast %19 : i32 to index
    %c0_5 = arith.constant 0 : index
    %21 = vector.load %arg2[%20, %c0_5] : memref<32x16xf32, #tpu.memory_space<vmem>>, vector<8x16xf32>
    %22 = arith.index_cast %19 : i32 to index
    %c0_6 = arith.constant 0 : index
    %23 = vector.load %arg3[%22, %c0_6] : memref<32x16xf32, #tpu.memory_space<vmem>>, vector<8x16xf32>
    %24 = arith.index_cast %19 : i32 to index
    %c0_7 = arith.constant 0 : index
    %25 = vector.load %arg4[%24, %c0_7] : memref<32x16xf32, #tpu.memory_space<vmem>>, vector<8x16xf32>
    %26 = arith.addf %21, %23 : vector<8x16xf32>
    %27 = arith.mulf %26, %25 : vector<8x16xf32>
    %28 = arith.mulf %21, %23 : vector<8x16xf32>
    %29 = arith.mulf %28, %25 : vector<8x16xf32>
    %30 = arith.addf %16, %27 : vector<8x16xf32>
    %31 = arith.addf %17, %29 : vector<8x16xf32>
    %c2_i32 = arith.constant 2 : i32
    %c8_i32_8 = arith.constant 8 : i32
    %32 = arith.muli %c2_i32, %c8_i32_8 : i32
    %33 = tpu.assume_multiple %32, 8 : i32
    %34 = arith.index_cast %33 : i32 to index
    %c0_9 = arith.constant 0 : index
    %35 = vector.load %arg2[%34, %c0_9] : memref<32x16xf32, #tpu.memory_space<vmem>>, vector<8x16xf32>
    %36 = arith.index_cast %33 : i32 to index
    %c0_10 = arith.constant 0 : index
    %37 = vector.load %arg3[%36, %c0_10] : memref<32x16xf32, #tpu.memory_space<vmem>>, vector<8x16xf32>
    %38 = arith.index_cast %33 : i32 to index
    %c0_11 = arith.constant 0 : index
    %39 = vector.load %arg4[%38, %c0_11] : memref<32x16xf32, #tpu.memory_space<vmem>>, vector<8x16xf32>
    %40 = arith.addf %35, %37 : vector<8x16xf32>
    %41 = arith.mulf %40, %39 : vector<8x16xf32>
    %42 = arith.mulf %35, %37 : vector<8x16xf32>
    %43 = arith.mulf %42, %39 : vector<8x16xf32>
    %44 = arith.addf %30, %41 : vector<8x16xf32>
    %45 = arith.addf %31, %43 : vector<8x16xf32>
    %c3_i32 = arith.constant 3 : i32
    %c8_i32_12 = arith.constant 8 : i32
    %46 = arith.muli %c3_i32, %c8_i32_12 : i32
    %47 = tpu.assume_multiple %46, 8 : i32
    %48 = arith.index_cast %47 : i32 to index
    %c0_13 = arith.constant 0 : index
    %49 = vector.load %arg2[%48, %c0_13] : memref<32x16xf32, #tpu.memory_space<vmem>>, vector<8x16xf32>
    %50 = arith.index_cast %47 : i32 to index
    %c0_14 = arith.constant 0 : index
    %51 = vector.load %arg3[%50, %c0_14] : memref<32x16xf32, #tpu.memory_space<vmem>>, vector<8x16xf32>
    %52 = arith.index_cast %47 : i32 to index
    %c0_15 = arith.constant 0 : index
    %53 = vector.load %arg4[%52, %c0_15] : memref<32x16xf32, #tpu.memory_space<vmem>>, vector<8x16xf32>
    %54 = arith.addf %49, %51 : vector<8x16xf32>
    %55 = arith.mulf %54, %53 : vector<8x16xf32>
    %56 = arith.mulf %49, %51 : vector<8x16xf32>
    %57 = arith.mulf %56, %53 : vector<8x16xf32>
    %58 = arith.addf %44, %55 : vector<8x16xf32>
    %59 = arith.addf %45, %57 : vector<8x16xf32>
    %c4_i32 = arith.constant 4 : i32
    %c0_16 = arith.constant 0 : index
    %c0_17 = arith.constant 0 : index
    %c0_18 = arith.constant 0 : index
    %60 = vector.load %arg6[%c0_16, %c0_17, %c0_18] : memref<1x8x16xf32, #tpu.memory_space<vmem>>, vector<1x8x16xf32>
    %61 = vector.shape_cast %60 : vector<1x8x16xf32> to vector<8x16xf32>
    %62 = arith.addf %61, %58 : vector<8x16xf32>
    %c0_19 = arith.constant 0 : index
    %c0_20 = arith.constant 0 : index
    %c0_21 = arith.constant 0 : index
    %63 = vector.load %arg6[%c0_19, %c0_20, %c0_21] : memref<1x8x16xf32, #tpu.memory_space<vmem>>, vector<1x8x16xf32>
    %64 = vector.shape_cast %63 : vector<1x8x16xf32> to vector<8x16xf32>
    %65 = vector.shape_cast %62 : vector<8x16xf32> to vector<1x8x16xf32>
    tpu.vector_store %arg6[%c0_19, %c0_20, %c0_21], %65 {strides = array<i32>} : memref<1x8x16xf32, #tpu.memory_space<vmem>>, vector<1x8x16xf32>,
    %c0_22 = arith.constant 0 : index
    %c0_23 = arith.constant 0 : index
    %c0_24 = arith.constant 0 : index
    %66 = vector.load %arg5[%c0_22, %c0_23, %c0_24] : memref<1x8x16xf32, #tpu.memory_space<vmem>>, vector<1x8x16xf32>
    %67 = vector.shape_cast %66 : vector<1x8x16xf32> to vector<8x16xf32>
    %68 = arith.addf %67, %59 : vector<8x16xf32>
    %c0_25 = arith.constant 0 : index
    %c0_26 = arith.constant 0 : index
    %c0_27 = arith.constant 0 : index
    %69 = vector.load %arg5[%c0_25, %c0_26, %c0_27] : memref<1x8x16xf32, #tpu.memory_space<vmem>>, vector<1x8x16xf32>
    %70 = vector.shape_cast %69 : vector<1x8x16xf32> to vector<8x16xf32>
    %71 = vector.shape_cast %68 : vector<8x16xf32> to vector<1x8x16xf32>
    tpu.vector_store %arg5[%c0_25, %c0_26, %c0_27], %71 {strides = array<i32>} : memref<1x8x16xf32, #tpu.memory_space<vmem>>, vector<1x8x16xf32>,
    return
  }
  func.func @transform_0(%arg0: i32, %arg1: i32) -> (i32, i32) {
    %c1_i32 = arith.constant 1 : i32
    %0 = arith.muli %arg0, %c1_i32 : i32
    %1 = arith.addi %0, %arg1 : i32
    %c0_i32 = arith.constant 0 : i32
    %c0_i32_0 = arith.constant 0 : i32
    return %1, %c0_i32 : i32, i32
  }
  func.func @transform_1(%arg0: i32, %arg1: i32) -> (i32, i32) {
    %c1_i32 = arith.constant 1 : i32
    %0 = arith.muli %arg0, %c1_i32 : i32
    %1 = arith.addi %0, %arg1 : i32
    %c0_i32 = arith.constant 0 : i32
    %c0_i32_0 = arith.constant 0 : i32
    return %1, %c0_i32 : i32, i32
  }
  func.func @transform_2(%arg0: i32, %arg1: i32) -> (i32, i32) {
    %c1_i32 = arith.constant 1 : i32
    %0 = arith.muli %arg0, %c1_i32 : i32
    %1 = arith.addi %0, %arg1 : i32
    %c0_i32 = arith.constant 0 : i32
    %c0_i32_0 = arith.constant 0 : i32
    return %1, %c0_i32 : i32, i32
  }
  func.func @transform_3(%arg0: i32, %arg1: i32) -> (i32, i32, i32) {
    %c0_i32 = arith.constant 0 : i32
    %c0_i32_0 = arith.constant 0 : i32
    %c0_i32_1 = arith.constant 0 : i32
    return %arg0, %c0_i32, %c0_i32_0 : i32, i32, i32
  }
  func.func @transform_4(%arg0: i32, %arg1: i32) -> (i32, i32, i32) {
    %c0_i32 = arith.constant 0 : i32
    %c0_i32_0 = arith.constant 0 : i32
    %c0_i32_1 = arith.constant 0 : i32
    return %arg0, %c0_i32, %c0_i32_0 : i32, i32, i32
  }
}

</mosaic_0001>

<bundles_post_ra>
// kernel: tpu_custom_call.1
= control target key start
LH: loop header
LB: loop body
LE: loop exit
PB: predicated region body
PF: predicated region fallthrough
CT: control target
= control target key end

     0   :  { %10 = vsyncpa [#allocation3], 0  ;;  %vm88_vm0 = vcmask 130048   ;;  %v249_v3 = vmov 0.0   ;;  %s341_s0 = inlined_call_operand.vmem [shape: f32[32,16], index: 0, kind: input, shape index: {}]   ;;  %s342_s1 = inlined_call_operand.vmem [shape: f32[32,16], index: 1, kind: input, shape index: {}]   ;;  %s343_s2 = inlined_call_operand.vmem [shape: f32[32,16], index: 2, kind: input, shape index: {}]   ;;  %s344_s3 = inlined_call_operand.hbm [shape: f32[1,8,16], index: 3, kind: output, shape index: {0}]   ;;  %s345_s4 = inlined_call_operand.hbm [shape: f32[1,8,16], index: 4, kind: output, shape index: {1}]  }
   0x1   :  { %v91_v0 = vld [vmem:[%s341_s0] sm:$0xff]  ;;  %89 = vst.msk [vmem:[#allocation2] sm:$0xff] %vm88_vm0, %v249_v3  ;;  %90 = vst.msk [vmem:[#allocation4] sm:$0xff] %vm88_vm0, %v249_v3  ;;  %v189_v5 = vld [vmem:[%s341_s0 + $0x8] sm:$0xff] }
   0x2   :  { %v92_v1 = vld [vmem:[%s342_s1] sm:$0xff]  ;;  %v190_v6 = vld [vmem:[%s342_s1 + $0x8] sm:$0xff]  ;;  %v192_v10 = vld [vmem:[%s341_s0 + $0x10] sm:$0xff] }
   0x3   :  { %v93_v2 = vld [vmem:[%s343_s2] sm:$0xff]  ;;  %v94_v4 = vadd.f32 %v92_v1, %v91_v0  ;;  %v191_v7 = vld [vmem:[%s343_s2 + $0x8] sm:$0xff]  ;;  %v96_v8 = vmul.f32 %v92_v1, %v91_v0  ;;  %v106_v9 = vadd.f32 %v190_v6, %v189_v5  ;;  %v193_v11 = vld [vmem:[%s342_s1 + $0x10] sm:$0xff]  ;;  %v108_v13 = vmul.f32 %v190_v6, %v189_v5 }
   0x4   :  { %v194_v12 = vld [vmem:[%s343_s2 + $0x10] sm:$0xff]  ;;  %v118_v15 = vadd.f32 %v193_v11, %v192_v10  ;;  %v195_v16 = vld [vmem:[%s341_s0 + $0x18] sm:$0xff]  ;;  %v120_v20 = vmul.f32 %v193_v11, %v192_v10 }
   0x5   :  { %v95_v14 = vmul.f32 %v94_v4, %v93_v2  ;;  %v196_v17 = vld [vmem:[%s342_s1 + $0x18] sm:$0xff]  ;;  %v97_v19 = vmul.f32 %v96_v8, %v93_v2  ;;  %v107_v21 = vmul.f32 %v191_v7, %v106_v9  ;;  %v109_v23 = vmul.f32 %v191_v7, %v108_v13 }
   0x6   :  { %v197_v18 = vld [vmem:[%s343_s2 + $0x18] sm:$0xff]  ;;  %v130_v22 = vadd.f32 %v196_v17, %v195_v16  ;;  %v132_v24 = vmul.f32 %v196_v17, %v195_v16 }
   0x7   :  { %11 = vsyncpa [#allocation5], 0  ;;  %v119_v25 = vmul.f32 %v194_v12, %v118_v15  ;;  %v121_v26 = vmul.f32 %v194_v12, %v120_v20  ;;  %v110_v27 = vadd.f32 %v107_v21, %v95_v14  ;;  %v111_v29 = vadd.f32 %v109_v23, %v97_v19  ;;  %s250_s0 = smov [#allocation2]   ;;  %s251_s2 = smov [#allocation4]  }
   0x8   :  { %v131_v28 = vmul.f32 %v197_v18, %v130_v22  ;;  %v133_v30 = vmul.f32 %v197_v18, %v132_v24  ;;  %v136_v33 = vld [vmem:[#allocation4] sm:$0xff]  ;;  %v140_v34 = vld [vmem:[#allocation2] sm:$0xff]  ;;  %s149_s1 = sshll.u32 %s250_s0, 4  ;;  %s159_s13 = sshll.u32 %s251_s2, 4  ;;  %s150_s1 = int_to_ptr.vmem [resolvable:$true] %s149_s1  ;;  %s160_s13 = int_to_ptr.vmem [resolvable:$true] %s159_s13 }
   0x9   :  { %v122_v31 = vadd.f32 %v119_v25, %v110_v27  ;;  %v123_v32 = vadd.f32 %v121_v26, %v111_v29  ;;  %s201_s14 = scalar_lea.vmem %s150_s1, 128  ;;  %p206_p1 = scmp.lt.s32.totalorder %s150_s1, %s150_s1 }
   0xa   :  { %p202_p0 = scmp.ne.s32.totalorder %s150_s1, %s201_s14  ;;  %p207_p2 = scmp.lt.s32.totalorder %s201_s14, %s201_s14 }
   0xb   :  { %v134_v35 = vadd.f32 %v131_v28, %v122_v31  ;;  %v135_v36 = vadd.f32 %v133_v30, %v123_v32 }
   0xc   :  { %p208_p3 = por %p207_p2, %p206_p1 }
   0xd   :  { %v137_v37 = vadd.f32 %v136_v33, %v134_v35  ;;  %v141_v38 = vadd.f32 %v140_v34, %v135_v36 }
   0xe   :  { %p209_p4 = pnand %p208_p3, %p202_p0 }
   0xf   :  { %139 = vst.msk [vmem:[#allocation4] sm:$0xff] %vm88_vm0, %v137_v37  ;;  %142 = vst.msk [vmem:[#allocation2] sm:$0xff] %vm88_vm0, %v141_v38 }
  0x10   :  { %212 = shalt.err (!%p209_p4)
}
  0x11   :  { %s213_s17 = scalar_lea.hbm %s344_s3, 128 }
  0x12   :  { %p214_p5 = scmp.ne.s32.totalorder %s344_s3, %s213_s17  ;;  %p217_p6 = scmp.lt.u32.totalorder %s213_s17, %s344_s3 }
  0x14   :  { %p219_p7 = pnand %p217_p6, %p214_p5 }
  0x16   :  { %222 = shalt.err (!%p219_p7)
}
  0x17   :  { %152 = dma.vmem_to_hbm [thread:$0]  %s150_s1, 128, %s344_s3, [#allocation3]  }
  0x18   :  { %s223_s24 = scalar_lea.vmem %s160_s13, 128  ;;  %p228_p9 = scmp.lt.s32.totalorder %s160_s13, %s160_s13 }
  0x19   :  { %p224_p8 = scmp.ne.s32.totalorder %s160_s13, %s223_s24  ;;  %p229_p10 = scmp.lt.s32.totalorder %s223_s24, %s223_s24 }
  0x1b   :  { %p230_p11 = por %p229_p10, %p228_p9 }
  0x1d   :  { %p231_p12 = pnand %p230_p11, %p224_p8 }
  0x1f   :  { %234 = shalt.err (!%p231_p12)
}
  0x20   :  { %s235_s27 = scalar_lea.hbm %s345_s4, 128 }
  0x21   :  { %p236_p13 = scmp.ne.s32.totalorder %s345_s4, %s235_s27  ;;  %p239_p0 = scmp.lt.u32.totalorder %s235_s27, %s345_s4 }
  0x23   :  { %p241_p1 = pnand %p239_p0, %p236_p13 }
  0x25   :  { %244 = shalt.err (!%p241_p1)
}
  0x26   :  { %162 = dma.vmem_to_hbm [thread:$0]  %s160_s13, 128, %s345_s4, [#allocation5]  }
  0x27   :  { %245 = dma.done.wait [#allocation3], 128  }
  0x28   :  { %246 = vsyncadd [#allocation3], 4294967168 }
  0x29   :  { %247 = dma.done.wait [#allocation5], 128  }
  0x2a   :  { %248 = vsyncadd [#allocation5], 4294967168 }
  0x2b   :  { %169 = vsyncpa [#allocation3], 1 }
  0x2c   :  { %170 = vsyncpa [#allocation5], 1 }

</bundles_post_ra>
